<compile_context>
chip_gen: v7x
topology: tpu7x:2x2x1
jax: 0.10.0
libtpu: 0.0.40
codegen_flags: <defaults>
</compile_context>

<pallas_src>
import jax
import jax.numpy as jnp
from jax.experimental import pallas as pl
from jax.experimental.pallas import tpu as pltpu


def _make_kernel(n_elems: int, batch: int):
    inv_n = 1.0 / float(n_elems)   # compile-time constants
    inv_b = 1.0 / float(batch)

    def kernel(labels_ref, classes_ref, images_ref, recon_ref, out_ref, acc_ref):
        bi = pl.program_id(0)
        dj = pl.program_id(1)

        @pl.when(jnp.logical_and(bi == 0, dj == 0))
        def _init():
            acc_ref[...] = jnp.zeros_like(acc_ref)

        # Streaming MSE partial: upcast to f32 in-kernel, accumulate elementwise
        # into the persistent f32 VMEM tile (VPU only, no per-step reduction).
        diff = recon_ref[...].astype(jnp.float32) - images_ref[...].astype(jnp.float32)
        acc_ref[...] += diff * diff

        is_last = jnp.logical_and(bi == pl.num_programs(0) - 1,
                                  dj == pl.num_programs(1) - 1)

        @pl.when(is_last)
        def _finalize():
            # Margin loss computed exactly once (labels/classes are VMEM-resident).
            classes = classes_ref[...].astype(jnp.float32)
            labels = labels_ref[...].astype(jnp.float32)
            left = jnp.maximum(0.9 - classes, 0.0) ** 2
            right = jnp.maximum(classes - 0.1, 0.0) ** 2
            margin = jnp.sum(labels * left + 0.5 * (1.0 - labels) * right)
            # Single cross-lane/sublane reduce of the accumulator, then scalar math.
            mse = jnp.sum(acc_ref[...]) * inv_n
            out_ref[0, 0] = (margin + 0.0005 * mse) * inv_b

    return kernel


def _pick_tile(dim: int, align: int, max_elems: int) -> int:
    """Largest tile that divides `dim`, is a multiple of `align`, and fits the
    element budget. Falls back to the full extent when `dim` is not aligned
    (Pallas then requires the block to equal the array dim)."""
    if dim <= align or dim % align != 0:
        return dim
    t = min(dim, max(align, (max_elems // align) * align))
    while dim % t:
        t -= align
    return t


def capsule_loss(images, labels, classes, reconstructions, *,
                 target_tile_bytes: int = 2 * 1024 * 1024):
    """images: (B, C, H, W); labels/classes: (B, K); reconstructions: (B, D)."""
    assert images.size == reconstructions.size
    b = reconstructions.shape[0]
    recon = reconstructions.reshape(b, -1)        # layout-preserving, no copy
    d = recon.shape[1]
    images_flat = images.reshape(b, d)            # matches images.view(B, -1); no cast

    itemsize = max(jnp.dtype(images_flat.dtype).itemsize,
                   jnp.dtype(recon.dtype).itemsize)

    # Tile the lane dim (multiples of 128) first, then the sublane/batch dim.
    max_tile_elems = max(128, target_tile_bytes // itemsize)
    td = _pick_tile(d, 128, max_tile_elems)
    tb = _pick_tile(b, 8, max(1, max_tile_elems // td))
    grid = (b // tb, d // td)

    # Explicit VMEM budget: 2 streaming inputs x double buffer + f32 accumulator
    # + small resident arrays + headroom; clamp to what every generation allows.
    est = 2 * 2 * tb * td * itemsize + tb * td * 4 + 4 * 1024 * 1024
    vmem_limit = int(min(max(est, 16 * 1024 * 1024), 64 * 1024 * 1024))

    kernel = _make_kernel(n_elems=b * d, batch=b)

    out = pl.pallas_call(
        kernel,
        out_shape=jax.ShapeDtypeStruct((1, 1), jnp.float32),
        grid_spec=pltpu.PrefetchScalarGridSpec(
            num_scalar_prefetch=0,
            grid=grid,
            in_specs=[
                # Small (B, K) arrays: resident in VMEM for the whole kernel.
                pl.BlockSpec(memory_space=pltpu.MemorySpace.VMEM),   # labels
                pl.BlockSpec(memory_space=pltpu.MemorySpace.VMEM),   # classes
                # Large streams: tiled + double-buffered by the Pallas pipeline.
                pl.BlockSpec((tb, td), lambda i, j: (i, j)),         # images (flat)
                pl.BlockSpec((tb, td), lambda i, j: (i, j)),         # reconstructions
            ],
            out_specs=pl.BlockSpec(memory_space=pltpu.MemorySpace.SMEM),  # scalar out
            scratch_shapes=[pltpu.VMEM((tb, td), jnp.float32)],            # f32 accumulator
        ),
        compiler_params=pltpu.CompilerParams(
            dimension_semantics=("arbitrary", "arbitrary"),
            vmem_limit_bytes=vmem_limit,
        ),
    )(labels, classes, images_flat, recon)
    return out[0, 0]


def _reference(images, labels, classes, reconstructions):
    left = jnp.maximum(0.9 - classes, 0.0) ** 2
    right = jnp.maximum(classes - 0.1, 0.0) ** 2
    margin = jnp.sum(labels * left + 0.5 * (1.0 - labels) * right)
    imgs = images.reshape(reconstructions.shape[0], -1)
    mse = jnp.mean((reconstructions - imgs) ** 2)
    return (margin + 0.0005 * mse) / images.shape[0]


if __name__ == "__main__":
    key = jax.random.PRNGKey(0)
    k1, k2, k3, k4 = jax.random.split(key, 4)

    B, C, H, W = 2, 4, 16, 16
    NUM_CLASSES = 2  # binary classification
    D = C * H * W

    images = jax.random.uniform(k1, (B, C, H, W), dtype=jnp.float32)
    classes = jax.random.uniform(k2, (B, NUM_CLASSES), dtype=jnp.float32)
    labels = jax.nn.one_hot(
        jax.random.randint(k3, (B,), 0, NUM_CLASSES), NUM_CLASSES
    ).astype(jnp.float32)
    reconstructions = jax.random.uniform(k4, (B, D), dtype=jnp.float32)

    ref = _reference(images, labels, classes, reconstructions)

    # Default tiling (single tile at these toy shapes).
    loss = jax.block_until_ready(capsule_loss(images, labels, classes, reconstructions))
    assert jnp.allclose(loss, ref, rtol=1e-5, atol=1e-6), (loss, ref)

    # Force the multi-step streaming path (2 tiles along D) so the grid
    # init / accumulate / finalize logic is exercised too.
    loss_tiled = jax.block_until_ready(
        capsule_loss(images, labels, classes, reconstructions, target_tile_bytes=2048)
    )
    assert jnp.allclose(loss_tiled, ref, rtol=1e-5, atol=1e-6), (loss_tiled, ref)

    print("KERNEL_OK")
</pallas_src>

<mosaic_0001>
module attributes {stable_mosaic.version = 11 : i64} {
  func.func @kernel(%arg0: i32, %arg1: i32, %arg2: memref<2x2xf32, #tpu.memory_space<vmem>>, %arg3: memref<2x2xf32, #tpu.memory_space<vmem>>, %arg4: memref<2x1024xf32, #tpu.memory_space<vmem>>, %arg5: memref<2x1024xf32, #tpu.memory_space<vmem>>, %arg6: memref<1x1xf32, #tpu.memory_space<smem>>, %arg7: memref<2x1024xf32, #tpu.memory_space<vmem>>) attributes {dimension_semantics = [#tpu.dimension_semantics<arbitrary>, #tpu.dimension_semantics<arbitrary>], iteration_bounds = array<i64: 1, 1>, scalar_prefetch = 0 : i64, scratch_operands = 1 : i64, tpu.core_type = #tpu.core_type<tc>, window_params = [{pipeline_mode = #tpu.pipeline_mode<synchronous>, transform_indices = @transform_0, window_bounds = array<i64: 2, 2>}, {pipeline_mode = #tpu.pipeline_mode<synchronous>, transform_indices = @transform_1, window_bounds = array<i64: 2, 2>}, {transform_indices = @transform_2, window_bounds = array<i64: 2, 1024>}, {transform_indices = @transform_3, window_bounds = array<i64: 2, 1024>}, {transform_indices = @transform_4, window_bounds = array<i64: 1, 1>}]} {
    %c0_i32 = arith.constant 0 : i32
    %0 = arith.cmpi eq, %arg0, %c0_i32 : i32
    %c0_i32_0 = arith.constant 0 : i32
    %1 = arith.cmpi eq, %arg1, %c0_i32_0 : i32
    %2 = arith.andi %0, %1 : i1
    %3 = arith.extui %2 : i1 to i32
    %c0_i32_1 = arith.constant 0 : i32
    %4 = arith.cmpi ne, %3, %c0_i32_1 : i32
    scf.if %4 {
      %cst = arith.constant 0.000000e+00 : f32
      %17 = vector.broadcast %cst : f32 to vector<2x1024xf32>
      %c0_12 = arith.constant 0 : index
      %c0_13 = arith.constant 0 : index
      %18 = vector.load %arg7[%c0_12, %c0_13] : memref<2x1024xf32, #tpu.memory_space<vmem>>, vector<2x1024xf32>
      tpu.vector_store %arg7[%c0_12, %c0_13], %17 {strides = array<i32>} : memref<2x1024xf32, #tpu.memory_space<vmem>>, vector<2x1024xf32>,
    } else {
    }
    %c0 = arith.constant 0 : index
    %c0_2 = arith.constant 0 : index
    %5 = vector.load %arg5[%c0, %c0_2] : memref<2x1024xf32, #tpu.memory_space<vmem>>, vector<2x1024xf32>
    %c0_3 = arith.constant 0 : index
    %c0_4 = arith.constant 0 : index
    %6 = vector.load %arg4[%c0_3, %c0_4] : memref<2x1024xf32, #tpu.memory_space<vmem>>, vector<2x1024xf32>
    %7 = arith.subf %5, %6 : vector<2x1024xf32>
    %c0_5 = arith.constant 0 : index
    %c0_6 = arith.constant 0 : index
    %8 = vector.load %arg7[%c0_5, %c0_6] : memref<2x1024xf32, #tpu.memory_space<vmem>>, vector<2x1024xf32>
    %9 = arith.mulf %7, %7 : vector<2x1024xf32>
    %10 = arith.addf %8, %9 : vector<2x1024xf32>
    %c0_7 = arith.constant 0 : index
    %c0_8 = arith.constant 0 : index
    %11 = vector.load %arg7[%c0_7, %c0_8] : memref<2x1024xf32, #tpu.memory_space<vmem>>, vector<2x1024xf32>
    tpu.vector_store %arg7[%c0_7, %c0_8], %10 {strides = array<i32>} : memref<2x1024xf32, #tpu.memory_space<vmem>>, vector<2x1024xf32>,
    %c0_i32_9 = arith.constant 0 : i32
    %12 = arith.cmpi eq, %arg0, %c0_i32_9 : i32
    %c0_i32_10 = arith.constant 0 : i32
    %13 = arith.cmpi eq, %arg1, %c0_i32_10 : i32
    %14 = arith.andi %12, %13 : i1
    %15 = arith.extui %14 : i1 to i32
    %c0_i32_11 = arith.constant 0 : i32
    %16 = arith.cmpi ne, %15, %c0_i32_11 : i32
    scf.if %16 {
      %c0_12 = arith.constant 0 : index
      %c0_13 = arith.constant 0 : index
      %17 = vector.load %arg3[%c0_12, %c0_13] : memref<2x2xf32, #tpu.memory_space<vmem>>, vector<2x2xf32>
      %c0_14 = arith.constant 0 : index
      %c0_15 = arith.constant 0 : index
      %18 = vector.load %arg2[%c0_14, %c0_15] : memref<2x2xf32, #tpu.memory_space<vmem>>, vector<2x2xf32>
      %cst = arith.constant 0.899999976 : f32
      %19 = vector.broadcast %cst : f32 to vector<2x2xf32>
      %20 = arith.subf %19, %17 : vector<2x2xf32>
      %cst_16 = arith.constant 0.000000e+00 : f32
      %21 = vector.broadcast %cst_16 : f32 to vector<2x2xf32>
      %22 = arith.maximumf %20, %21 : vector<2x2xf32>
      %23 = arith.mulf %22, %22 : vector<2x2xf32>
      %cst_17 = arith.constant 1.000000e-01 : f32
      %24 = vector.broadcast %cst_17 : f32 to vector<2x2xf32>
      %25 = arith.subf %17, %24 : vector<2x2xf32>
      %cst_18 = arith.constant 0.000000e+00 : f32
      %26 = vector.broadcast %cst_18 : f32 to vector<2x2xf32>
      %27 = arith.maximumf %25, %26 : vector<2x2xf32>
      %28 = arith.mulf %27, %27 : vector<2x2xf32>
      %29 = arith.mulf %18, %23 : vector<2x2xf32>
      %cst_19 = arith.constant 1.000000e+00 : f32
      %30 = vector.broadcast %cst_19 : f32 to vector<2x2xf32>
      %31 = arith.subf %30, %18 : vector<2x2xf32>
      %cst_20 = arith.constant 5.000000e-01 : f32
      %32 = vector.broadcast %cst_20 : f32 to vector<2x2xf32>
      %33 = arith.mulf %32, %31 : vector<2x2xf32>
      %34 = arith.mulf %33, %28 : vector<2x2xf32>
      %35 = arith.addf %29, %34 : vector<2x2xf32>
      %36 = vector.shape_cast %35 : vector<2x2xf32> to vector<1x2x2xf32>
      %cst_21 = arith.constant dense<0.000000e+00> : vector<1xf32>
      %37 = vector.multi_reduction <add>, %36, %cst_21 [1, 2] : vector<1x2x2xf32> to vector<1xf32>
      %38 = vector.shape_cast %37 : vector<1xf32> to vector<1x1x1xf32>
      %39 = vector.extract %38[0, 0, 0] : f32 from vector<1x1x1xf32>
      %c0_22 = arith.constant 0 : index
      %c0_23 = arith.constant 0 : index
      %40 = vector.load %arg7[%c0_22, %c0_23] : memref<2x1024xf32, #tpu.memory_space<vmem>>, vector<2x1024xf32>
      %41 = vector.shape_cast %40 : vector<2x1024xf32> to vector<1x2x1024xf32>
      %cst_24 = arith.constant dense<0.000000e+00> : vector<1xf32>
      %42 = vector.multi_reduction <add>, %41, %cst_24 [1, 2] : vector<1x2x1024xf32> to vector<1xf32>
      %43 = vector.shape_cast %42 : vector<1xf32> to vector<1x1x1xf32>
      %44 = vector.extract %43[0, 0, 0] : f32 from vector<1x1x1xf32>
      %cst_25 = arith.constant 4.8828125E-4 : f32
      %45 = arith.mulf %44, %cst_25 : f32
      %cst_26 = arith.constant 5.000000e-04 : f32
      %46 = arith.mulf %cst_26, %45 : f32
      %47 = arith.addf %39, %46 : f32
      %cst_27 = arith.constant 5.000000e-01 : f32
      %48 = arith.mulf %47, %cst_27 : f32
      %c0_28 = arith.constant 0 : index
      %c0_29 = arith.constant 0 : index
      %49 = memref.load %arg6[%c0_28, %c0_29] : memref<1x1xf32, #tpu.memory_space<smem>>
      memref.store %48, %arg6[%c0_28, %c0_29] : memref<1x1xf32, #tpu.memory_space<smem>>
    } else {
    }
    return
  }
  func.func @transform_0(%arg0: i32, %arg1: i32) -> (i32, i32) {
    %c0_i32 = arith.constant 0 : i32
    %c0_i32_0 = arith.constant 0 : i32
    %c0_i32_1 = arith.constant 0 : i32
    return %c0_i32, %c0_i32_0 : i32, i32
  }
  func.func @transform_1(%arg0: i32, %arg1: i32) -> (i32, i32) {
    %c0_i32 = arith.constant 0 : i32
    %c0_i32_0 = arith.constant 0 : i32
    %c0_i32_1 = arith.constant 0 : i32
    return %c0_i32, %c0_i32_0 : i32, i32
  }
  func.func @transform_2(%arg0: i32, %arg1: i32) -> (i32, i32) {
    %c0_i32 = arith.constant 0 : i32
    return %arg0, %arg1 : i32, i32
  }
  func.func @transform_3(%arg0: i32, %arg1: i32) -> (i32, i32) {
    %c0_i32 = arith.constant 0 : i32
    return %arg0, %arg1 : i32, i32
  }
  func.func @transform_4(%arg0: i32, %arg1: i32) -> (i32, i32) {
    %c0_i32 = arith.constant 0 : i32
    %c0_i32_0 = arith.constant 0 : i32
    %c0_i32_1 = arith.constant 0 : i32
    return %c0_i32, %c0_i32_0 : i32, i32
  }
}

</mosaic_0001>

<bundles_post_ra>
// kernel: tpu_custom_call.1
= control target key start
LH: loop header
LB: loop body
LE: loop exit
PB: predicated region body
PF: predicated region fallthrough
CT: control target
= control target key end

     0   :  { %9 = vsyncpa [#allocation4], 0  ;;  %s374_s0 = inlined_call_operand.hbm [shape: f32[2,2], index: 0, kind: input, shape index: {}]   ;;  %s375_s1 = inlined_call_operand.vmem [shape: f32[2,2], index: 1, kind: input, shape index: {}]   ;;  %s376_s2 = inlined_call_operand.hbm [shape: f32[2,1024], index: 2, kind: input, shape index: {}]   ;;  %s377_s3 = inlined_call_operand.hbm [shape: f32[2,1024], index: 3, kind: input, shape index: {}]   ;;  %s378_s4 = inlined_call_operand.hbm [shape: f32[1,1], index: 4, kind: output, shape index: {}]  }
   0x1   :  { %10 = vsyncpa [#allocation7], 0 }
   0x2   :  { %11 = vsyncpa [#allocation5], 0  ;;  %s285_s15 = smov [#allocation6]   ;;  %s286_s17 = smov [#allocation3]  }
   0x3   :  { %s30_s16 = sshll.u32 %s285_s15, 4  ;;  %s18_s18 = sshll.u32 %s286_s17, 4  ;;  %s31_s16 = int_to_ptr.vmem [resolvable:$true] %s30_s16  ;;  %s19_s18 = int_to_ptr.vmem [resolvable:$true] %s18_s18 }
   0x4   :  { %s203_s21 = scalar_lea.hbm %s376_s2, 256 }
   0x5   :  { %p204_p0 = scmp.ne.s32.totalorder %s376_s2, %s203_s21  ;;  %p207_p1 = scmp.lt.u32.totalorder %s203_s21, %s376_s2 }
   0x7   :  { %p209_p2 = pnand %p207_p1, %p204_p0 }
   0x9   :  { %212 = shalt.err (!%p209_p2)
}
   0xa   :  { %s213_s26 = scalar_lea.vmem %s31_s16, 256  ;;  %p218_p4 = scmp.lt.s32.totalorder %s31_s16, %s31_s16 }
   0xb   :  { %p214_p3 = scmp.ne.s32.totalorder %s31_s16, %s213_s26  ;;  %p219_p5 = scmp.lt.s32.totalorder %s213_s26, %s213_s26 }
   0xd   :  { %p220_p6 = por %p219_p5, %p218_p4 }
   0xf   :  { %p221_p7 = pnand %p220_p6, %p214_p3 }
  0x11   :  { %224 = shalt.err (!%p221_p7)
}
  0x12   :  { %33 = dma.hbm_to_vmem [thread:$0]  %s376_s2, 256, %s31_s16, [#allocation7]  }
  0x13   :  { %s225_s5 = scalar_lea.hbm %s374_s0, 32 }
  0x14   :  { %p226_p8 = scmp.ne.s32.totalorder %s374_s0, %s225_s5  ;;  %p229_p9 = scmp.lt.u32.totalorder %s225_s5, %s374_s0 }
  0x16   :  { %p231_p10 = pnand %p229_p9, %p226_p8 }
  0x18   :  { %234 = shalt.err (!%p231_p10)
}
  0x19   :  { %s235_s10 = scalar_lea.vmem %s19_s18, 32  ;;  %p240_p12 = scmp.lt.s32.totalorder %s19_s18, %s19_s18 }
  0x1a   :  { %p236_p11 = scmp.ne.s32.totalorder %s19_s18, %s235_s10  ;;  %p241_p13 = scmp.lt.s32.totalorder %s235_s10, %s235_s10 }
  0x1c   :  { %p242_p0 = por %p241_p13, %p240_p12 }
  0x1e   :  { %p243_p1 = pnand %p242_p0, %p236_p11 }
  0x20   :  { %246 = shalt.err (!%p243_p1)
}
  0x21   :  { %21 = dma.hbm_to_vmem [thread:$0]  %s374_s0, 32, %s19_s18, [#allocation4]  }
  0x22   :  { %s287_s12 = smov [#allocation8]   ;;  %s247_s16 = scalar_lea.hbm %s377_s3, 256 }
  0x23   :  { %s40_s13 = sshll.u32 %s287_s12, 4  ;;  %p248_p2 = scmp.ne.s32.totalorder %s377_s3, %s247_s16  ;;  %s41_s13 = int_to_ptr.vmem [resolvable:$true] %s40_s13 }
  0x24   :  { %p251_p3 = scmp.lt.u32.totalorder %s247_s16, %s377_s3 }
  0x26   :  { %p253_p4 = pnand %p251_p3, %p248_p2 }
  0x28   :  { %256 = shalt.err (!%p253_p4)
}
  0x29   :  { %s257_s22 = scalar_lea.vmem %s41_s13, 256  ;;  %p262_p6 = scmp.lt.s32.totalorder %s41_s13, %s41_s13 }
  0x2a   :  { %p258_p5 = scmp.ne.s32.totalorder %s41_s13, %s257_s22  ;;  %p263_p7 = scmp.lt.s32.totalorder %s257_s22, %s257_s22 }
  0x2c   :  { %p264_p8 = por %p263_p7, %p262_p6 }
  0x2e   :  { %p265_p9 = pnand %p264_p8, %p258_p5 }
  0x30   :  { %268 = shalt.err (!%p265_p9)
}
  0x31   :  { %43 = dma.hbm_to_vmem [thread:$0]  %s377_s3, 256, %s41_s13, [#allocation7]  }
  0x32   :  { %279 = dma.done.wait [#allocation4], 32  }
  0x33   :  { %280 = vsyncadd [#allocation4], 4294967264 }
  0x34   :  { %281 = dma.done.wait [#allocation7], 512  }
  0x35   :  { %282 = vsyncadd [#allocation7], 4294966784  ;;  %v288_v0 = vmov 1983009808   ;;  %v109_v2 = vlaneseq  ;;  %v77_v5 = vld [vmem:[%s375_s1] sm:$0x3] }
  0x36   :  { %v107_v1 = vunpack.c.l.s4 %v288_v0  ;;  %v78_v6 = vld [vmem:[#allocation3] sm:$0x3]  ;;  %v61_v7 = vld [vmem:[#allocation8] sm:$0xff]  ;;  %v79_v8 = vsub.f32 0.9, %v77_v5  ;;  %v63_v12 = vld [vmem:[#allocation6] sm:$0xff] }
  0x37   :  { %v110_v4 = vshrl.u32 %v109_v2, 7  ;;  %v193_v9 = vadd.f32 -0.1, %v77_v5  ;;  %v86_v10 = vsub.f32 1.0, %v78_v6  ;;  %v62_v11 = vld [vmem:[#allocation8 + $0x8] sm:$0xff]  ;;  %v64_v13 = vld [vmem:[#allocation6 + $0x8] sm:$0xff]  ;;  %v65_v18 = vsub.f32 %v61_v7, %v63_v12 }
  0x38   :  { %v108_v3 = vunpack.c.0.s8 %v107_v1  ;;  %v80_v15 = vmax.f32 %v79_v8, 0.0  ;;  %v66_v19 = vsub.f32 %v62_v11, %v64_v13  ;;  %vm147_vm0 = vcmask 1041408   ;;  %s269_s5 = scalar_lea.hbm %s378_s4, 16 }
  0x39   :  { %v83_v16 = vmax.f32 %v193_v9, 0.0  ;;  %v87_v17 = vmul.f32 0.5, %v86_v10  ;;  %v69_v22 = vmul.f32 %v65_v18, %v65_v18  ;;  %vm90_vm1 = vcmask 9216   ;;  %p270_p10 = scmp.ne.s32.totalorder %s378_s4, %s269_s5  ;;  %p273_p11 = scmp.lt.u32.totalorder %s269_s5, %s378_s4 }
  0x3a   :  { %v111_v14 = vsub.s32 %v108_v3, %v110_v4  ;;  %v81_v20 = vmul.f32 %v80_v15, %v80_v15  ;;  %v70_v23 = vmul.f32 %v66_v19, %v66_v19 }
  0x3b   :  { %v84_v21 = vmul.f32 %v83_v16, %v83_v16  ;;  %v105_v26 = vcombine.high %v69_v22, %v69_v22  ;;  %p275_p12 = pnand %p273_p11, %p270_p10 }
  0x3c   :  { %v85_v24 = vmul.f32 %v81_v20, %v78_v6  ;;  %v112_v27 = vrot.slane %v69_v22, %v111_v14  ;;  %v122_v28 = vcombine.high %v70_v23, %v70_v23  ;;  %v129_v29 = vrot.slane %v70_v23, %v111_v14 }
  0x3d   :  { %v88_v25 = vmul.f32 %v87_v17, %v84_v21  ;;  %v119_v31 = vrot.slane %v105_v26, %v111_v14 }
  0x3e   :  { %v120_v32 = vcombine.high %v112_v27, %v112_v27  ;;  %v148_v33 = vsel %vm147_vm0, %v112_v27, 0.0  ;;  %v136_v39 = vrot.slane %v122_v28, %v111_v14  ;;  %v137_v40 = vcombine.high %v129_v29, %v129_v29 }
  0x3f   :  { %v89_v30 = vadd.f32 %v88_v25, %v85_v24  ;;  %v121_v35 = vcombine.high %v119_v31, %v119_v31  ;;  %v151_v37 = vsel %vm147_vm0, %v119_v31, 0.0  ;;  %v155_v43 = vsel %vm147_vm0, %v129_v29, 0.0 }
  0x40   :  { %v149_v36 = vsel %vm147_vm0, %v120_v32, 0.0  ;;  %v138_v45 = vcombine.high %v136_v39, %v136_v39  ;;  %v157_v46 = vsel %vm147_vm0, %v137_v40, 0.0  ;;  %v159_v48 = vsel %vm147_vm0, %v136_v39, 0.0 }
  0x41   :  { %v91_v34 = vsel %vm90_vm1, %v89_v30, 0.0  ;;  %v150_v38 = vadd.f32 %v149_v36, %v148_v33  ;;  %v153_v41 = vsel %vm147_vm0, %v121_v35, 0.0 }
  0x42   :  { %92 = vadd.xlane.f32.xlu0 %v91_v34  ;;  %v161_v50 = vsel %vm147_vm0, %v138_v45, 0.0 }
  0x43   :  { %v152_v42 = vadd.f32 %v151_v37, %v150_v38 }
  0x45   :  { %v154_v44 = vadd.f32 %v153_v41, %v152_v42 }
  0x47   :  { %v156_v47 = vadd.f32 %v155_v43, %v154_v44 }
  0x49   :  { %v158_v49 = vadd.f32 %v157_v46, %v156_v47 }
  0x4b   :  { %v160_v51 = vadd.f32 %v159_v48, %v158_v49 }
  0x4d   :  { %v162_v52 = vadd.f32 %v161_v50, %v160_v51 }
  0x4f   :  { %163 = vadd.xlane.f32.xlu0 %v162_v52 }
  0xcf   :  { %v93_v53 = vpop.xlane.xlu0 %92 }
  0xd0   :  { %v94_v54 = vrot.slane %v93_v53, 4 }
  0xd2   :  { %v95_v55 = vadd.f32 %v94_v54, %v93_v53 }
  0xd4   :  { %v96_v56 = vrot.slane %v95_v55, 2 }
  0xd6   :  { %v97_v57 = vadd.f32 %v96_v56, %v95_v55 }
  0xd8   :  { %v98_v58 = vrot.slane %v97_v57, 1 }
  0xda   :  { %v99_v59 = vadd.f32 %v98_v58, %v97_v57 }
  0xdc   :  { %194 = vpush %v99_v59  ;;  %v164_v60 = vpop.xlane.xlu0 %163 }
  0xdd   :  { %v165_v61 = vrot.slane %v164_v60, 4 }
  0xdf   :  { %v166_v62 = vadd.f32 %v165_v61, %v164_v60 }
  0xe1   :  { %v167_v63 = vrot.slane %v166_v62, 2 }
  0xe3   :  { %v168_v0 = vadd.f32 %v167_v63, %v166_v62 }
  0xe5   :  { %v169_v1 = vrot.slane %v168_v0, 1 }
  0xe7   :  { %v170_v2 = vadd.f32 %v169_v1, %v168_v0 }
  0xe9   :  { %196 = vpush %v170_v2 }
 0x10d   :  { %s195_s1 = spop %194 }
 0x11a   :  { %s197_s3 = spop %196 }
 0x11b   :  { %s172_s25 = smul.f32 0.00048828125, %s197_s3 }
 0x11d   :  { %s173_s26 = smul.f32 0.0005, %s172_s25 }
 0x11f   :  { %s174_s27 = sadd.f32 %s195_s1, %s173_s26 }
 0x121   :  { %s175_s28 = smul.f32 0.5, %s174_s27 }
 0x123   :  { %177 = sst [smem:[#allocation9]] %s175_s28 }
 0x124   :  { %278 = shalt.err (!%p275_p12)
}
 0x125   :  { %s289_s10 = smov [#allocation9]  }
 0x126   :  { %185 = dma.smem_to_hbm %s289_s10, 16, %s378_s4, [#allocation5]  }
 0x127   :  { %283 = dma.done.wait [#allocation5], 16  }
 0x128   :  { %284 = vsyncadd [#allocation5], 4294967280 }
 0x129   :  { %189 = sfence }
 0x12a   :  { %190 = vsyncpa [#allocation4], 1 }
 0x12b   :  { %191 = vsyncpa [#allocation7], 1 }
 0x12c   :  { %192 = vsyncpa [#allocation5], 1 }

</bundles_post_ra>
